<compile_context>
chip_gen: v5e
topology: v5e:2x2
jax: 0.10.0
libtpu: 0.0.40
codegen_flags: <defaults>
</compile_context>

<pallas_src>
import jax
import jax.numpy as jnp
from jax.experimental import pallas as pl
from jax.experimental.pallas import tpu as pltpu


# ----------------------------- hyper-parameters ------------------------------
INPUT_SIZE = 32
HIDDEN_SIZE = 64
NUM_ASCS = 2
BATCH = 8
SEQ_LEN = 8

DT = 0.05
TAU = DT            # neuron_params.tau is None -> tau = dt
SIGMA_V = 1.0
V_RESET = 0.0
R_CONST = 0.1
I0 = 0.0
DT_OVER_TAU = DT / TAU

LANE = 128          # TPU lane width: keep last dims 128-dense


# ------------------------------- helpers --------------------------------------
def _round_up(n, m):
    return ((n + m - 1) // m) * m


def _pad_last(a, target, value=0.0):
    pad = target - a.shape[-1]
    if pad == 0:
        return a
    return jnp.pad(a, [(0, 0)] * (a.ndim - 1) + [(0, pad)], constant_values=value)


def prepare_params(params):
    """Hoist all parameter-only transforms + lane-dense packing (done ONCE)."""
    wiv, wlat = params["weight_iv"], params["weight_lat"]
    in_size, h = wiv.shape
    a = params["trans_k_j"].shape[0]
    hp = _round_up(h, LANE)

    wiv_p = _pad_last(wiv, hp)                                          # (In, HP)
    # Pad wlat ROWS with zeros too: firing pad lanes must never leak into syn.
    wlat_p = _pad_last(jnp.pad(wlat, [(0, hp - h), (0, 0)]), hp)        # (HP, HP)
    # Fused [x ; firing_delayed(padded)] weight for the packed single-step kernel.
    w_cat = jnp.concatenate([wiv_p, wlat_p], axis=0)                    # (In+HP, HP)

    # thresh padded with a huge value -> sigmoid in pad lanes is ~0 (self-healing
    # pads: firing pad lanes stay ~0 across arbitrarily many chained steps).
    thresh_p = _pad_last(params["thresh"], hp, value=1e9)               # (1, HP)

    k_m = jax.nn.sigmoid(params["trans_k_m"]) / DT                      # (1, H)
    km_r_dt = _pad_last(DT * k_m * R_CONST, hp)                         # (1, HP)
    one_m_km = _pad_last(1.0 - DT * k_m, hp)                            # (1, HP)

    def fold(p):   # (A, 1, H) -> (1, A*HP): ASC axis folded into lanes
        return _pad_last(p.reshape(a, h), hp).reshape(1, a * hp)

    asc_r_f = fold(1.0 - 2.0 * jax.nn.sigmoid(params["trans_r_j"]))
    a_j_f = fold(params["a_j"])
    asc_decay_f = fold(1.0 - DT * (jax.nn.sigmoid(params["trans_k_j"]) / DT))

    return dict(w_cat=w_cat, wiv_p=wiv_p, wlat_p=wlat_p, thresh=thresh_p,
                km_r_dt=km_r_dt, one_m_km=one_m_km,
                asc_r=asc_r_f, a_j=a_j_f, asc_decay=asc_decay_f)


def pack_state(firing, voltage, ascurrent):
    """Pad + lane-fold the neuron state ONCE (keep it packed across steps)."""
    b, h = firing.shape
    a = ascurrent.shape[0]
    hp = _round_up(h, LANE)
    f_p = _pad_last(firing, hp)
    v_p = _pad_last(voltage, hp)
    a_p = _pad_last(jnp.transpose(ascurrent, (1, 0, 2)), hp).reshape(b, a * hp)
    return f_p, v_p, a_p


def unpack_state(f_p, v_p, a_p, h, num_ascs):
    b, hp = f_p.shape
    asc = a_p.reshape(b, num_ascs, hp)[:, :, :h].transpose(1, 0, 2)
    return f_p[:, :h], v_p[:, :h], asc


# --------------------------- single-step kernel --------------------------------
def glifr_step_kernel(xfd_ref, f_ref, v_ref, a_ref,
                      w_ref, thresh_ref, asc_r_ref, a_j_ref, asc_decay_ref,
                      km_r_dt_ref, one_m_km_ref,
                      f_out, v_out, a_out, syn_out):
    firing = f_ref[...]                 # (B, HP)
    voltage = v_ref[...]                # (B, HP)
    hp = firing.shape[1]
    a = a_ref.shape[1] // hp

    # fused synaptic current: [x, firing_delayed_padded] @ [W_iv; W_lat] (1 MXU dot)
    syn = jnp.dot(xfd_ref[...], w_ref[...], preferred_element_type=jnp.float32)

    # adaptation (after-spike) currents: per-ASC lane-aligned slices, no concat
    asc_sum = None
    for i in range(a):
        lo, hi = i * hp, (i + 1) * hp
        s = a_ref[:, lo:hi]
        s_new = ((s * asc_r_ref[:, lo:hi] + a_j_ref[:, lo:hi]) * firing * DT_OVER_TAU
                 + asc_decay_ref[:, lo:hi] * s)
        a_out[:, lo:hi] = s_new
        asc_sum = s_new if asc_sum is None else asc_sum + s_new

    # membrane voltage
    v_new = (syn
             + km_r_dt_ref[...] * (asc_sum + I0)
             + one_m_km_ref[...] * voltage
             - DT_OVER_TAU * firing * (voltage - V_RESET))

    # spiking nonlinearity
    f_new = jax.nn.sigmoid((v_new - thresh_ref[...]) * (1.0 / SIGMA_V))

    f_out[...] = f_new
    v_out[...] = v_new
    syn_out[...] = syn


def glifr_forward_packed(prep, x, firing_delayed_p, f_p, v_p, a_p):
    """Single GLIFR step on packed (padded, lane-folded) state. State buffers are
    donated / aliased in place; callers should chain the returned state."""
    b, hp = f_p.shape
    a = a_p.shape[1] // hp

    xfd = jnp.concatenate([x, firing_delayed_p], axis=1)               # (B, In+HP)

    vmem = pl.BlockSpec(memory_space=pltpu.MemorySpace.VMEM)
    out_shapes = (
        jax.ShapeDtypeStruct((b, hp), jnp.float32),       # firing
        jax.ShapeDtypeStruct((b, hp), jnp.float32),       # voltage
        jax.ShapeDtypeStruct((b, a * hp), jnp.float32),   # asc (lane-folded)
        jax.ShapeDtypeStruct((b, hp), jnp.float32),       # syncurrent
    )
    return pl.pallas_call(
        glifr_step_kernel,
        out_shape=out_shapes,
        in_specs=[vmem] * 11,
        out_specs=(vmem, vmem, vmem, vmem),
        input_output_aliases={1: 0, 2: 1, 3: 2},   # state reused in place
    )(xfd, f_p, v_p, a_p,
      prep["w_cat"], prep["thresh"], prep["asc_r"], prep["a_j"],
      prep["asc_decay"], prep["km_r_dt"], prep["one_m_km"])


def glifr_forward(prep, x, firing, voltage, ascurrent, syncurrent,
                  firing_delayed=None):
    """Compat wrapper mirroring GLIFR.forward (unpacked in / unpacked out).
    For hot loops use glifr_forward_packed (state stays packed) or glifr_sequence."""
    del syncurrent  # overwritten, never read (matches the torch module)
    h = firing.shape[1]
    a = ascurrent.shape[0]

    f_p, v_p, a_p = pack_state(firing, voltage, ascurrent)
    if firing_delayed is None:
        fd_p = f_p
    else:
        fd_p = _pad_last(firing_delayed, f_p.shape[1])

    f_new, v_new, a_new, syn = glifr_forward_packed(prep, x, fd_p, f_p, v_p, a_p)
    f_u, v_u, a_u = unpack_state(f_new, v_new, a_new, h, a)
    return f_u, v_u, a_u, syn[:, :h]


# -------------------- sequence-fused kernel (single invocation) ----------------
def glifr_seq_kernel(xflat_ref, f0_ref, v0_ref, a0_ref,
                     wiv_ref, wlat_ref, thresh_ref, asc_r_ref, a_j_ref,
                     asc_decay_ref, km_r_dt_ref, one_m_km_ref,
                     f_seq_ref, v_fin_ref, a_fin_ref):
    b, hp = f0_ref.shape
    a = a0_ref.shape[1] // hp
    t_len = f_seq_ref.shape[0]

    # Hoisted, state-independent input projection: ONE (T*B, In) x (In, HP) dot
    # (fills T*B MXU rows instead of B rows per step).
    syn_x = jnp.dot(xflat_ref[...], wiv_ref[...],
                    preferred_element_type=jnp.float32)           # (T*B, HP)

    wlat = wlat_ref[...]
    thresh = thresh_ref[...]
    km_r_dt = km_r_dt_ref[...]
    one_m_km = one_m_km_ref[...]

    firing = f0_ref[...]
    voltage = v0_ref[...]
    asc = [a0_ref[:, i * hp:(i + 1) * hp] for i in range(a)]
    asc_r = [asc_r_ref[:, i * hp:(i + 1) * hp] for i in range(a)]
    a_j = [a_j_ref[:, i * hp:(i + 1) * hp] for i in range(a)]
    asc_dec = [asc_decay_ref[:, i * hp:(i + 1) * hp] for i in range(a)]

    # T is small and static: fully unrolled recurrence (no grid, no per-step
    # launch overhead; the scheduler sees the whole T-step window).
    for t in range(t_len):
        syn = syn_x[t * b:(t + 1) * b, :] + jnp.dot(
            firing, wlat, preferred_element_type=jnp.float32)

        asc_sum = None
        new_asc = []
        for i in range(a):
            s_new = ((asc[i] * asc_r[i] + a_j[i]) * firing * DT_OVER_TAU
                     + asc_dec[i] * asc[i])
            new_asc.append(s_new)
            asc_sum = s_new if asc_sum is None else asc_sum + s_new
        asc = new_asc

        voltage = (syn
                   + km_r_dt * (asc_sum + I0)
                   + one_m_km * voltage
                   - DT_OVER_TAU * firing * (voltage - V_RESET))
        firing = jax.nn.sigmoid((voltage - thresh) * (1.0 / SIGMA_V))

        f_seq_ref[t] = firing        # one lane-dense (B, HP) store per step

    # Final state written ONCE (no per-step final-state stores).
    v_fin_ref[...] = voltage
    for i in range(a):
        a_fin_ref[:, i * hp:(i + 1) * hp] = asc[i]


def glifr_sequence(prep, x_seq, firing0, voltage0, asc0):
    """Run T GLIFR steps in ONE pallas_call; everything resident in VMEM."""
    t_len, b, in_size = x_seq.shape
    h = firing0.shape[1]
    a = asc0.shape[0]
    hp = _round_up(h, LANE)

    f0, v0, a0 = pack_state(firing0, voltage0, asc0)
    x_flat = x_seq.reshape(t_len * b, in_size)           # batched input projection

    vmem = pl.BlockSpec(memory_space=pltpu.MemorySpace.VMEM)
    out_shapes = (
        jax.ShapeDtypeStruct((t_len, b, hp), jnp.float32),   # firing history
        jax.ShapeDtypeStruct((b, hp), jnp.float32),          # final voltage
        jax.ShapeDtypeStruct((b, a * hp), jnp.float32),      # final asc (folded)
    )
    f_seq, v_fin, a_fin = pl.pallas_call(
        glifr_seq_kernel,
        out_shape=out_shapes,
        in_specs=[vmem] * 12,
        out_specs=(vmem, vmem, vmem),
    )(x_flat, f0, v0, a0,
      prep["wiv_p"], prep["wlat_p"], prep["thresh"], prep["asc_r"],
      prep["a_j"], prep["asc_decay"], prep["km_r_dt"], prep["one_m_km"])

    f_seq = f_seq[:, :, :h]
    a_fin = a_fin.reshape(b, a, hp)[:, :, :h].transpose(1, 0, 2)
    return f_seq, v_fin[:, :h], a_fin


# --------------------------- pure-JAX reference --------------------------------
def glifr_reference(params, x, firing, voltage, ascurrent, firing_delayed):
    syn = x @ params["weight_iv"] + firing_delayed @ params["weight_lat"]
    asc_r = 1.0 - 2.0 * jax.nn.sigmoid(params["trans_r_j"])
    k_j = jax.nn.sigmoid(params["trans_k_j"]) / DT
    asc_new = ((ascurrent * asc_r + params["a_j"]) * firing[None] * (DT / TAU)
               + (1.0 - DT * k_j) * ascurrent)
    k_m = jax.nn.sigmoid(params["trans_k_m"]) / DT
    v_new = (syn + DT * k_m * R_CONST * (jnp.sum(asc_new, axis=0) + I0)
             + (1.0 - DT * k_m) * voltage
             - (DT / TAU) * firing * (voltage - V_RESET))
    f_new = jax.nn.sigmoid((v_new - params["thresh"]) / SIGMA_V)
    return f_new, v_new, asc_new, syn


# ----------------------------------- main --------------------------------------
if __name__ == "__main__":
    key = jax.random.PRNGKey(0)
    keys = jax.random.split(key, 16)

    # Weights use the hom_init_ scale (uniform +/- sqrt(0.6/H)) so the recurrent
    # dynamics are well-conditioned for the multi-step numerical check.
    wscale = (0.6 / HIDDEN_SIZE) ** 0.5
    params = {
        "weight_iv":  jax.random.uniform(keys[0], (INPUT_SIZE, HIDDEN_SIZE),
                                         jnp.float32, -wscale, wscale),
        "weight_lat": jax.random.uniform(keys[1], (HIDDEN_SIZE, HIDDEN_SIZE),
                                         jnp.float32, -wscale, wscale),
        "thresh":     jax.random.normal(keys[2], (1, HIDDEN_SIZE), jnp.float32),
        "trans_k_m":  jax.random.normal(keys[3], (1, HIDDEN_SIZE), jnp.float32),
        "trans_k_j":  jax.random.normal(keys[4], (NUM_ASCS, 1, HIDDEN_SIZE), jnp.float32),
        "trans_r_j":  jax.random.normal(keys[5], (NUM_ASCS, 1, HIDDEN_SIZE), jnp.float32),
        "a_j":        jax.random.normal(keys[6], (NUM_ASCS, 1, HIDDEN_SIZE), jnp.float32),
    }
    prep = prepare_params(params)   # parameter transforms hoisted (done once)

    # -------- single-step check (matches GLIFR.forward) --------
    x          = jax.random.normal(keys[7],  (BATCH, INPUT_SIZE), jnp.float32)
    firing     = jax.random.uniform(keys[8], (BATCH, HIDDEN_SIZE), jnp.float32)
    voltage    = jax.random.normal(keys[9],  (BATCH, HIDDEN_SIZE), jnp.float32)
    ascurrent  = jax.random.normal(keys[10], (NUM_ASCS, BATCH, HIDDEN_SIZE), jnp.float32)
    syncurrent = jnp.zeros((BATCH, HIDDEN_SIZE), jnp.float32)

    rf, rv, ra, rs = glifr_reference(params, x, firing, voltage, ascurrent, firing)

    f_new, v_new, asc_new, syn_new = glifr_forward(
        prep, x, firing, voltage, ascurrent, syncurrent, firing_delayed=None)
    jax.block_until_ready((f_new, v_new, asc_new, syn_new))

    assert jnp.allclose(f_new, rf, atol=1e-4, rtol=1e-4)
    assert jnp.allclose(v_new, rv, atol=2e-4, rtol=2e-4)
    assert jnp.allclose(asc_new, ra, atol=1e-5, rtol=1e-5)
    assert jnp.allclose(syn_new, rs, atol=2e-4, rtol=2e-4)

    # -------- sequence-fused check (T steps in ONE pallas_call) --------
    x_seq = jax.random.normal(keys[11], (SEQ_LEN, BATCH, INPUT_SIZE), jnp.float32)
    f0 = jnp.zeros((BATCH, HIDDEN_SIZE), jnp.float32)
    v0 = jnp.zeros((BATCH, HIDDEN_SIZE), jnp.float32)
    a0 = jnp.zeros((NUM_ASCS, BATCH, HIDDEN_SIZE), jnp.float32)

    f_seq, v_fin, a_fin = glifr_sequence(prep, x_seq, f0, v0, a0)
    jax.block_until_ready((f_seq, v_fin, a_fin))

    rf_t, rv_t, ra_t = f0, v0, a0
    ref_fs = []
    for t in range(SEQ_LEN):
        rf_t, rv_t, ra_t, _ = glifr_reference(
            params, x_seq[t], rf_t, rv_t, ra_t, rf_t)
        ref_fs.append(rf_t)
    ref_fs = jnp.stack(ref_fs)

    assert jnp.allclose(f_seq, ref_fs, atol=2e-3, rtol=2e-3)
    assert jnp.allclose(v_fin, rv_t, atol=2e-3, rtol=2e-3)
    assert jnp.allclose(a_fin, ra_t, atol=2e-3, rtol=2e-3)

    print("KERNEL_OK")
</pallas_src>

<mosaic_0001>
module attributes {stable_mosaic.version = 11 : i64} {
  func.func @glifr_step_kernel(%arg0: memref<8x160xf32, #tpu.memory_space<vmem>>, %arg1: memref<8x128xf32, #tpu.memory_space<vmem>>, %arg2: memref<8x128xf32, #tpu.memory_space<vmem>>, %arg3: memref<8x256xf32, #tpu.memory_space<vmem>>, %arg4: memref<160x128xf32, #tpu.memory_space<vmem>>, %arg5: memref<1x128xf32, #tpu.memory_space<vmem>>, %arg6: memref<1x256xf32, #tpu.memory_space<vmem>>, %arg7: memref<1x256xf32, #tpu.memory_space<vmem>>, %arg8: memref<1x256xf32, #tpu.memory_space<vmem>>, %arg9: memref<1x128xf32, #tpu.memory_space<vmem>>, %arg10: memref<1x128xf32, #tpu.memory_space<vmem>>, %arg11: memref<8x128xf32, #tpu.memory_space<vmem>>, %arg12: memref<8x128xf32, #tpu.memory_space<vmem>>, %arg13: memref<8x256xf32, #tpu.memory_space<vmem>>, %arg14: memref<8x128xf32, #tpu.memory_space<vmem>>) attributes {dimension_semantics = [], scalar_prefetch = 0 : i64, scratch_operands = 0 : i64, tpu.core_type = #tpu.core_type<tc>} {
    %c0 = arith.constant 0 : index
    %c0_0 = arith.constant 0 : index
    %0 = vector.load %arg1[%c0, %c0_0] : memref<8x128xf32, #tpu.memory_space<vmem>>, vector<8x128xf32>
    %c0_1 = arith.constant 0 : index
    %c0_2 = arith.constant 0 : index
    %1 = vector.load %arg2[%c0_1, %c0_2] : memref<8x128xf32, #tpu.memory_space<vmem>>, vector<8x128xf32>
    %c0_3 = arith.constant 0 : index
    %c0_4 = arith.constant 0 : index
    %2 = vector.load %arg0[%c0_3, %c0_4] : memref<8x160xf32, #tpu.memory_space<vmem>>, vector<8x160xf32>
    %c0_5 = arith.constant 0 : index
    %c0_6 = arith.constant 0 : index
    %3 = vector.load %arg4[%c0_5, %c0_6] : memref<160x128xf32, #tpu.memory_space<vmem>>, vector<160x128xf32>
    %cst = arith.constant dense<0.000000e+00> : vector<8x128xf32>
    %4 = tpu.matmul %2, %3, %cst {dimension_numbers = #tpu.dot_dimension_numbers<[1], [0], [0], [1], [0, 0, 1, 1], [], []>} : vector<8x160xf32>, vector<160x128xf32>, vector<8x128xf32> -> vector<8x128xf32>
    %c0_7 = arith.constant 0 : index
    %c0_8 = arith.constant 0 : index
    %5 = vector.load %arg3[%c0_7, %c0_8] : memref<8x256xf32, #tpu.memory_space<vmem>>, vector<8x128xf32>
    %c0_9 = arith.constant 0 : index
    %c0_10 = arith.constant 0 : index
    %6 = vector.load %arg6[%c0_9, %c0_10] : memref<1x256xf32, #tpu.memory_space<vmem>>, vector<1x128xf32>
    %7 = vector.broadcast %6 : vector<1x128xf32> to vector<8x128xf32>
    %8 = arith.mulf %5, %7 : vector<8x128xf32>
    %c0_11 = arith.constant 0 : index
    %c0_12 = arith.constant 0 : index
    %9 = vector.load %arg7[%c0_11, %c0_12] : memref<1x256xf32, #tpu.memory_space<vmem>>, vector<1x128xf32>
    %10 = vector.broadcast %9 : vector<1x128xf32> to vector<8x128xf32>
    %11 = arith.addf %8, %10 : vector<8x128xf32>
    %12 = arith.mulf %11, %0 : vector<8x128xf32>
    %cst_13 = arith.constant 1.000000e+00 : f32
    %13 = vector.broadcast %cst_13 : f32 to vector<8x128xf32>
    %14 = arith.mulf %12, %13 : vector<8x128xf32>
    %c0_14 = arith.constant 0 : index
    %c0_15 = arith.constant 0 : index
    %15 = vector.load %arg8[%c0_14, %c0_15] : memref<1x256xf32, #tpu.memory_space<vmem>>, vector<1x128xf32>
    %16 = vector.broadcast %15 : vector<1x128xf32> to vector<8x128xf32>
    %17 = arith.mulf %16, %5 : vector<8x128xf32>
    %18 = arith.addf %14, %17 : vector<8x128xf32>
    %c0_16 = arith.constant 0 : index
    %c0_17 = arith.constant 0 : index
    %19 = vector.load %arg13[%c0_16, %c0_17] : memref<8x256xf32, #tpu.memory_space<vmem>>, vector<8x128xf32>
    tpu.vector_store %arg13[%c0_16, %c0_17], %18 {strides = array<i32>} : memref<8x256xf32, #tpu.memory_space<vmem>>, vector<8x128xf32>,
    %c0_18 = arith.constant 0 : index
    %c128 = arith.constant 128 : index
    %20 = vector.load %arg3[%c0_18, %c128] : memref<8x256xf32, #tpu.memory_space<vmem>>, vector<8x128xf32>
    %c0_19 = arith.constant 0 : index
    %c128_20 = arith.constant 128 : index
    %21 = vector.load %arg6[%c0_19, %c128_20] : memref<1x256xf32, #tpu.memory_space<vmem>>, vector<1x128xf32>
    %22 = vector.broadcast %21 : vector<1x128xf32> to vector<8x128xf32>
    %23 = arith.mulf %20, %22 : vector<8x128xf32>
    %c0_21 = arith.constant 0 : index
    %c128_22 = arith.constant 128 : index
    %24 = vector.load %arg7[%c0_21, %c128_22] : memref<1x256xf32, #tpu.memory_space<vmem>>, vector<1x128xf32>
    %25 = vector.broadcast %24 : vector<1x128xf32> to vector<8x128xf32>
    %26 = arith.addf %23, %25 : vector<8x128xf32>
    %27 = arith.mulf %26, %0 : vector<8x128xf32>
    %cst_23 = arith.constant 1.000000e+00 : f32
    %28 = vector.broadcast %cst_23 : f32 to vector<8x128xf32>
    %29 = arith.mulf %27, %28 : vector<8x128xf32>
    %c0_24 = arith.constant 0 : index
    %c128_25 = arith.constant 128 : index
    %30 = vector.load %arg8[%c0_24, %c128_25] : memref<1x256xf32, #tpu.memory_space<vmem>>, vector<1x128xf32>
    %31 = vector.broadcast %30 : vector<1x128xf32> to vector<8x128xf32>
    %32 = arith.mulf %31, %20 : vector<8x128xf32>
    %33 = arith.addf %29, %32 : vector<8x128xf32>
    %c0_26 = arith.constant 0 : index
    %c128_27 = arith.constant 128 : index
    %34 = vector.load %arg13[%c0_26, %c128_27] : memref<8x256xf32, #tpu.memory_space<vmem>>, vector<8x128xf32>
    tpu.vector_store %arg13[%c0_26, %c128_27], %33 {strides = array<i32>} : memref<8x256xf32, #tpu.memory_space<vmem>>, vector<8x128xf32>,
    %35 = arith.addf %18, %33 : vector<8x128xf32>
    %c0_28 = arith.constant 0 : index
    %c0_29 = arith.constant 0 : index
    %36 = vector.load %arg9[%c0_28, %c0_29] : memref<1x128xf32, #tpu.memory_space<vmem>>, vector<1x128xf32>
    %cst_30 = arith.constant 0.000000e+00 : f32
    %37 = vector.broadcast %cst_30 : f32 to vector<8x128xf32>
    %38 = arith.addf %35, %37 : vector<8x128xf32>
    %39 = vector.broadcast %36 : vector<1x128xf32> to vector<8x128xf32>
    %40 = arith.mulf %39, %38 : vector<8x128xf32>
    %41 = arith.addf %4, %40 : vector<8x128xf32>
    %c0_31 = arith.constant 0 : index
    %c0_32 = arith.constant 0 : index
    %42 = vector.load %arg10[%c0_31, %c0_32] : memref<1x128xf32, #tpu.memory_space<vmem>>, vector<1x128xf32>
    %43 = vector.broadcast %42 : vector<1x128xf32> to vector<8x128xf32>
    %44 = arith.mulf %43, %1 : vector<8x128xf32>
    %45 = arith.addf %41, %44 : vector<8x128xf32>
    %cst_33 = arith.constant 1.000000e+00 : f32
    %46 = vector.broadcast %cst_33 : f32 to vector<8x128xf32>
    %47 = arith.mulf %46, %0 : vector<8x128xf32>
    %cst_34 = arith.constant 0.000000e+00 : f32
    %48 = vector.broadcast %cst_34 : f32 to vector<8x128xf32>
    %49 = arith.subf %1, %48 : vector<8x128xf32>
    %50 = arith.mulf %47, %49 : vector<8x128xf32>
    %51 = arith.subf %45, %50 : vector<8x128xf32>
    %c0_35 = arith.constant 0 : index
    %c0_36 = arith.constant 0 : index
    %52 = vector.load %arg5[%c0_35, %c0_36] : memref<1x128xf32, #tpu.memory_space<vmem>>, vector<1x128xf32>
    %53 = vector.broadcast %52 : vector<1x128xf32> to vector<8x128xf32>
    %54 = arith.subf %51, %53 : vector<8x128xf32>
    %cst_37 = arith.constant 1.000000e+00 : f32
    %55 = vector.broadcast %cst_37 : f32 to vector<8x128xf32>
    %56 = arith.mulf %54, %55 : vector<8x128xf32>
    %57 = arith.negf %56 : vector<8x128xf32>
    %58 = math.exp %57 : vector<8x128xf32>
    %cst_38 = arith.constant 1.000000e+00 : f32
    %59 = vector.broadcast %cst_38 : f32 to vector<8x128xf32>
    %60 = arith.addf %59, %58 : vector<8x128xf32>
    %61 = arith.divf %59, %60 : vector<8x128xf32>
    %c0_39 = arith.constant 0 : index
    %c0_40 = arith.constant 0 : index
    %62 = vector.load %arg11[%c0_39, %c0_40] : memref<8x128xf32, #tpu.memory_space<vmem>>, vector<8x128xf32>
    tpu.vector_store %arg11[%c0_39, %c0_40], %61 {strides = array<i32>} : memref<8x128xf32, #tpu.memory_space<vmem>>, vector<8x128xf32>,
    %c0_41 = arith.constant 0 : index
    %c0_42 = arith.constant 0 : index
    %63 = vector.load %arg12[%c0_41, %c0_42] : memref<8x128xf32, #tpu.memory_space<vmem>>, vector<8x128xf32>
    tpu.vector_store %arg12[%c0_41, %c0_42], %51 {strides = array<i32>} : memref<8x128xf32, #tpu.memory_space<vmem>>, vector<8x128xf32>,
    %c0_43 = arith.constant 0 : index
    %c0_44 = arith.constant 0 : index
    %64 = vector.load %arg14[%c0_43, %c0_44] : memref<8x128xf32, #tpu.memory_space<vmem>>, vector<8x128xf32>
    tpu.vector_store %arg14[%c0_43, %c0_44], %4 {strides = array<i32>} : memref<8x128xf32, #tpu.memory_space<vmem>>, vector<8x128xf32>,
    return
  }
}

</mosaic_0001>

<bundles_post_ra>
// kernel: tpu_custom_call.1
= control target key start
LH: loop header
LB: loop body
LE: loop exit
PB: predicated region body
PF: predicated region fallthrough
CT: control target
= control target key end

     0   :  { %20 = vsyncpa [#allocation3], 0  ;;  %s688_s0 = inlined_call_operand.vmem [shape: f32[8,160], index: 0, kind: input, shape index: {}]   ;;  %s689_s1 = inlined_call_operand.hbm [shape: f32[8,128], index: 1, kind: input, shape index: {}, may-alias: {1,11}]   ;;  %s690_s2 = inlined_call_operand.hbm [shape: f32[8,128], index: 2, kind: input, shape index: {}, may-alias: {2,12}]   ;;  %s691_s3 = inlined_call_operand.hbm [shape: f32[8,256], index: 3, kind: input, shape index: {}, may-alias: {3,13}]   ;;  %s692_s4 = inlined_call_operand.hbm [shape: f32[160,128], index: 4, kind: input, shape index: {}]   ;;  %s693_s5 = inlined_call_operand.vmem [shape: f32[1,128], index: 5, kind: input, shape index: {}]   ;;  %s694_s6 = inlined_call_operand.vmem [shape: f32[1,256], index: 6, kind: input, shape index: {}]   ;;  %s695_s7 = inlined_call_operand.vmem [shape: f32[1,256], index: 7, kind: input, shape index: {}]   ;;  %s696_s8 = inlined_call_operand.vmem [shape: f32[1,256], index: 8, kind: input, shape index: {}]   ;;  %s697_s9 = inlined_call_operand.vmem [shape: f32[1,128], index: 9, kind: input, shape index: {}]   ;;  %s698_s10 = inlined_call_operand.vmem [shape: f32[1,128], index: 10, kind: input, shape index: {}]   ;;  %s699_s11 = inlined_call_operand.hbm [shape: f32[8,128], index: 11, kind: output, shape index: {0}, may-alias: {1,11}]   ;;  %s700_s12 = inlined_call_operand.hbm [shape: f32[8,128], index: 12, kind: output, shape index: {1}, may-alias: {2,12}]   ;;  %s701_s13 = inlined_call_operand.hbm [shape: f32[8,256], index: 13, kind: output, shape index: {2}, may-alias: {3,13}]   ;;  %s702_s14 = inlined_call_operand.hbm [shape: f32[8,128], index: 14, kind: output, shape index: {3}]  }
   0x1   :  { %21 = vsyncpa [#allocation6], 0 }
   0x2   :  { %22 = vsyncpa [#allocation9], 0 }
   0x3   :  { %23 = vsyncpa [#allocation4], 0 }
   0x4   :  { %24 = vsyncpa [#allocation12], 0  ;;  %s44_s15 = sshll.u32 %s690_s2, 4  ;;  %s45_s15 = int_to_ptr.hbm [resolvable:$true] %s44_s15 }
   0x5   :  { %25 = vsyncpa [#allocation15], 0  ;;  %s546_s16 = smov [#allocation5]   ;;  %s33_s20 = sshll.u32 %s689_s1, 4  ;;  %s34_s20 = int_to_ptr.hbm [resolvable:$true] %s33_s20 }
   0x6   :  { %s46_s17 = sshll.u32 %s546_s16, 4  ;;  %s547_s21 = smov [#allocation2]   ;;  %s47_s17 = int_to_ptr.vmem [resolvable:$true] %s46_s17 }
   0x7   :  { %49 = dma.hbm_to_vmem [thread:$0]  %s45_s15, 128, %s47_s17, [#allocation6]  }
   0x8   :  { %s35_s22 = sshll.u32 %s547_s21, 4  ;;  %s55_s25 = sshll.u32 %s691_s3, 4  ;;  %s36_s22 = int_to_ptr.vmem [resolvable:$true] %s35_s22  ;;  %s56_s25 = int_to_ptr.hbm [resolvable:$true] %s55_s25 }
   0x9   :  { %38 = dma.hbm_to_vmem [thread:$0]  %s34_s20, 128, %s36_s22, [#allocation3]  }
   0xa   :  { %s65_s27 = sshll.u32 %s692_s4, 4  ;;  %s548_s28 = smov [#allocation7]   ;;  %s66_s27 = int_to_ptr.hbm [resolvable:$true] %s65_s27 }
   0xb   :  { %s57_s29 = sshll.u32 %s548_s28, 4  ;;  %s549_s1 = smov [#allocation8]   ;;  %s58_s29 = int_to_ptr.vmem [resolvable:$true] %s57_s29 }
   0xc   :  { %60 = dma.hbm_to_vmem [thread:$0]  %s56_s25, 256, %s58_s29, [#allocation6]  }
   0xd   :  { %s67_s30 = sshll.u32 %s549_s1, 4  ;;  %s550_s15 = smov 128   ;;  %s68_s30 = int_to_ptr.vmem [resolvable:$true] %s67_s30 }
   0xe   :  { %s551_s16 = smov 8  }
   0xf   :  { %73 = dma.hbm_to_vmem [thread:$0]  %s66_s27, 2560, %s68_s30, [#allocation9], %s550_s15, %s550_s15, %s551_s16  }
  0x10   :  { %534 = dma.done.wait [#allocation3], 128  }
  0x11   :  { %535 = vsyncadd [#allocation3], 4294967168 }
  0x12   :  { %536 = dma.done.wait [#allocation6], 384  }
  0x13   :  { %537 = vsyncadd [#allocation6], 4294966912 }
  0x14   :  { %538 = dma.done.wait [#allocation9], 2560  }
  0x15   :  { %539 = vsyncadd [#allocation9], 4294964736  ;;  %v121_v0 = vld [vmem:[#allocation8 + $0x78] sm:$0xff]  ;;  %v120_v1 = vld [vmem:[#allocation8 + $0x70] sm:$0xff]  ;;  %vm126_vm0 = vcmask 261120   ;;  %s291_s3 = sshll.u32 %s702_s14, 4  ;;  %s292_s3 = int_to_ptr.hbm [resolvable:$true] %s291_s3 }
  0x16   :  { %130 = vmatpush.msra.mxu0 %v121_v0  ;;  %v119_v2 = vld [vmem:[#allocation8 + $0x68] sm:$0xff]  ;;  %v118_v3 = vld [vmem:[#allocation8 + $0x60] sm:$0xff]  ;;  %v125_v4 = vld [vmem:[#allocation8 + $0x98] sm:$0xff]  ;;  %s269_s18 = sshll.u32 %s700_s12, 4  ;;  %s554_s14 = smov [#allocation13]   ;;  %s270_s18 = int_to_ptr.hbm [resolvable:$true] %s269_s18 }
  0x17   :  { %v117_v5 = vld [vmem:[#allocation8 + $0x58] sm:$0xff]  ;;  %162 = vmatpush.msra.mxu1 %v125_v4  ;;  %v124_v6 = vld [vmem:[#allocation8 + $0x90] sm:$0xff]  ;;  %v123_v8 = vld [vmem:[#allocation8 + $0x88] sm:$0xff]  ;;  %s278_s21 = sshll.u32 %s554_s14, 4  ;;  %s280_s24 = sshll.u32 %s701_s13, 4  ;;  %s279_s21 = int_to_ptr.vmem [resolvable:$true] %s278_s21  ;;  %s281_s24 = int_to_ptr.hbm [resolvable:$true] %s280_s24 }
  0x18   :  { %131 = vmatpush.msra.mxu0 %v120_v1  ;;  %v116_v7 = vld [vmem:[#allocation8 + $0x50] sm:$0xff]  ;;  %v122_v9 = vld [vmem:[#allocation8 + $0x80] sm:$0xff]  ;;  %v105_v10 = vld [vmem:[%s688_s0 + $0x8] sm:$0xff] }
  0x19   :  { %163 = vmatpush.msra.mxu1 %v124_v6  ;;  %v115_v11 = vld [vmem:[#allocation8 + $0x48] sm:$0xff]  ;;  %v114_v12 = vld [vmem:[#allocation8 + $0x40] sm:$0xff]  ;;  %v113_v13 = vld [vmem:[#allocation8 + $0x38] sm:$0xff] }
  0x1a   :  { %132 = vmatpush.msra.mxu0 %v119_v2  ;;  %v112_v14 = vld [vmem:[#allocation8 + $0x30] sm:$0xff]  ;;  %v111_v15 = vld [vmem:[#allocation8 + $0x28] sm:$0xff]  ;;  %v110_v16 = vld [vmem:[#allocation8 + $0x20] sm:$0xff] }
  0x1b   :  { %164 = vmatpush.msra.mxu1 %v123_v8  ;;  %v109_v17 = vld [vmem:[#allocation8 + $0x18] sm:$0xff]  ;;  %v108_v18 = vld [vmem:[#allocation8 + $0x10] sm:$0xff]  ;;  %v107_v19 = vld [vmem:[#allocation8 + $0x8] sm:$0xff] }
  0x1c   :  { %133 = vmatpush.msra.mxu0 %v118_v3  ;;  %v106_v20 = vld [vmem:[#allocation8] sm:$0xff]  ;;  %v170_v24 = vld [vmem:[#allocation7] sm:$0xff]  ;;  %v189_v25 = vld [vmem:[#allocation7 + $0x8] sm:$0xff] }
  0x1d   :  { %165 = vmatpush.msra.mxu1 %v122_v9  ;;  %v104_v21 = vld [vmem:[%s688_s0] sm:$0xff]  ;;  %v103_v44 = vld [vmem:[#allocation5] sm:$0xff]  ;;  %s258_s0 = sshll.u32 %s699_s11, 4  ;;  %s259_s0 = int_to_ptr.hbm [resolvable:$true] %s258_s0 }
  0x1e   :  { %134 = vmatpush.msra.mxu0 %v117_v5  ;;  %317 = vmatmul.msk.f32.vlgmr.msra.gmra.mxu1 %vm126_vm0, %v105_v10  ;;  %v329_v22 = vld [vmem:[%s694_s6] ss:$0 sm:$0xff]  ;;  %v332_v23 = vld [vmem:[%s694_s6 + $0x1] ss:$0 sm:$0xff] }
  0x1f   :  { %v175_v26 = vmul.f32 %v329_v22, %v170_v24  ;;  %v330_v27 = vld [vmem:[%s695_s7] ss:$0 sm:$0xff]  ;;  %v194_v28 = vmul.f32 %v332_v23, %v189_v25  ;;  %v333_v29 = vld [vmem:[%s695_s7 + $0x1] ss:$0 sm:$0xff] }
  0x20   :  { %135 = vmatpush.msra.mxu0 %v116_v7  ;;  %v331_v31 = vld [vmem:[%s696_s8] ss:$0 sm:$0xff]  ;;  %v334_v33 = vld [vmem:[%s696_s8 + $0x1] ss:$0 sm:$0xff]  ;;  %s552_s8 = smov [#allocation14]  }
  0x21   :  { %v180_v30 = vadd.f32 %v330_v27, %v175_v26  ;;  %v199_v32 = vadd.f32 %v333_v29, %v194_v28  ;;  %v102_v34 = vld [vmem:[#allocation2] sm:$0xff]  ;;  %v186_v36 = vmul.f32 %v331_v31, %v170_v24  ;;  %v205_v38 = vmul.f32 %v334_v33, %v189_v25  ;;  %s289_s30 = sshll.u32 %s552_s8, 4  ;;  %s290_s30 = int_to_ptr.vmem [resolvable:$true] %s289_s30 }
  0x22   :  { %136 = vmatpush.msra.mxu0 %v115_v11  ;;  %v335_v42 = vld [vmem:[%s697_s9] ss:$0 sm:$0xff]  ;;  %v222_v51 = vmul.f32 %v103_v44, %v102_v34  ;;  %s553_s9 = smov [#allocation11]  }
  0x23   :  { %v181_v35 = vmul.f32 %v180_v30, %v102_v34  ;;  %v200_v37 = vmul.f32 %v199_v32, %v102_v34  ;;  %v336_v43 = vld [vmem:[%s698_s10] ss:$0 sm:$0xff]  ;;  %s267_s4 = sshll.u32 %s553_s9, 4  ;;  %s268_s4 = int_to_ptr.vmem [resolvable:$true] %s267_s4 }
  0x24   :  { %137 = vmatpush.msra.mxu0 %v114_v12  ;;  %v220_v49 = vmul.f32 %v336_v43, %v103_v44  ;;  %v337_v53 = vld [vmem:[%s693_s5] ss:$0 sm:$0xff]  ;;  %s555_s5 = smov [#allocation10]  }
  0x25   :  { %v187_v39 = vadd.f32 %v186_v36, %v181_v35  ;;  %v206_v40 = vadd.f32 %v205_v38, %v200_v37  ;;  %s256_s12 = sshll.u32 %s555_s5, 4  ;;  %s257_s12 = int_to_ptr.vmem [resolvable:$true] %s256_s12 }
  0x26   :  { %138 = vmatpush.msra.mxu0 %v113_v13 }
  0x27   :  { %188 = vst [vmem:[#allocation13] sm:$0xff] %v187_v39  ;;  %v208_v41 = vadd.f32 %v206_v40, %v187_v39 }
  0x28   :  { %139 = vmatpush.msra.mxu0 %v112_v14  ;;  %207 = vst [vmem:[#allocation13 + $0x8] sm:$0xff] %v206_v40 }
  0x29   :  { %v214_v46 = vmul.f32 %v335_v42, %v208_v41 }
  0x2a   :  { %140 = vmatpush.msra.mxu0 %v111_v15 }
  0x2c   :  { %141 = vmatpush.msra.mxu0 %v110_v16 }
  0x2e   :  { %142 = vmatpush.msra.mxu0 %v109_v17 }
  0x30   :  { %143 = vmatpush.msra.mxu0 %v108_v18 }
  0x32   :  { %144 = vmatpush.msra.mxu0 %v107_v19 }
  0x34   :  { %145 = vmatpush.msra.mxu0 %v106_v20 }
  0x35   :  { %146 = vmatmul.f32.vlgmr.msra.gmra.mxu0 %v104_v21 }
  0x9b   :  { %v167_v45 = vpop.f32.mrf.mxu1 }
  0xb2   :  { %v147_v47 = vpop.f32.mrf.mxu0 }
  0xb3   :  { %v168_v48 = vadd.f32 %v167_v45, %v147_v47 }
  0xb5   :  { %v215_v50 = vadd.f32 %v214_v46, %v168_v48  ;;  %250 = vst [vmem:[#allocation14] sm:$0xff] %v168_v48 }
  0xb6   :  { %294 = dma.vmem_to_hbm [thread:$0]  %s290_s30, 128, %s292_s3, [#allocation15]  }
  0xb7   :  { %v221_v52 = vadd.f32 %v220_v49, %v215_v50 }
  0xb9   :  { %v223_v54 = vsub.f32 %v221_v52, %v222_v51 }
  0xbb   :  { %v228_v55 = vsub.f32 %v223_v54, %v337_v53  ;;  %249 = vst [vmem:[#allocation11] sm:$0xff] %v223_v54 }
  0xbc   :  { %272 = dma.vmem_to_hbm [thread:$0]  %s268_s4, 128, %s270_s18, [#allocation12]  }
  0xbd   :  { %v318_v56 = vmul.f32 -1.442695, %v228_v55  ;;  %283 = dma.vmem_to_hbm [thread:$0]  %s279_s21, 256, %s281_s24, [#allocation12]  }
  0xbf   :  { %338 = vpow2.f32 %v318_v56 }
  0xc5   :  { %v339_v57 = vpop.eup %338 }
  0xc6   :  { %v232_v58 = vadd.f32 1.0, %v339_v57 }
  0xc8   :  { %340 = vrcp.f32 %v232_v58  ;;  %v244_v62 = vand.u32 2147483648, %v232_v58  ;;  %v242_v0 = vand.u32 2147483647, %v232_v58  ;;  %vm238_vm2 = vweird.f32 %v232_v58 }
  0xca   :  { %v245_v2 = vor.u32 1.1754944e-38, %v244_v62  ;;  %vm243_vm4 = vcmp.eq.f32.partialorder %v242_v0, 8.507059e+37 }
  0xce   :  { %v341_v59 = vpop.eup %340 }
  0xcf   :  { %v234_v60 = vmul.f32 %v341_v59, %v232_v58  ;;  %vm239_vm1 = vweird.f32 %v341_v59 }
  0xd0   :  { %vm240_vm3 = vmor %vm238_vm2, %vm239_vm1 }
  0xd1   :  { %v235_v61 = vsub.f32 1.0, %v234_v60 }
  0xd3   :  { %v236_v63 = vmul.f32 %v341_v59, %v235_v61 }
  0xd5   :  { %v237_v1 = vadd.f32 %v341_v59, %v236_v63 }
  0xd7   :  { %v241_v3 = vsel %vm240_vm3, %v341_v59, %v237_v1 }
  0xd8   :  { %v246_v4 = vsel %vm243_vm4, %v245_v2, %v241_v3 }
  0xd9   :  { %248 = vst [vmem:[#allocation10] sm:$0xff] %v246_v4 }
  0xda   :  { %261 = dma.vmem_to_hbm [thread:$0]  %s257_s12, 128, %s259_s0, [#allocation4]  }
  0xdb   :  { %540 = dma.done.wait [#allocation4], 128  }
  0xdc   :  { %541 = vsyncadd [#allocation4], 4294967168 }
  0xdd   :  { %542 = dma.done.wait [#allocation12], 384  }
  0xde   :  { %543 = vsyncadd [#allocation12], 4294966912 }
  0xdf   :  { %544 = dma.done.wait [#allocation15], 128  }
  0xe0   :  { %545 = vsyncadd [#allocation15], 4294967168 }
  0xe1   :  { %311 = vsyncpa [#allocation3], 1 }
  0xe2   :  { %312 = vsyncpa [#allocation6], 1 }
  0xe3   :  { %313 = vsyncpa [#allocation9], 1 }
  0xe4   :  { %314 = vsyncpa [#allocation4], 1 }
  0xe5   :  { %315 = vsyncpa [#allocation12], 1 }
  0xe6   :  { %316 = vsyncpa [#allocation15], 1 }

</bundles_post_ra>
